<compile_context>
chip_gen: v7x
topology: tpu7x:2x2x1
jax: 0.10.0
libtpu: 0.0.40
codegen_flags: <defaults>
</compile_context>

<pallas_src>
import jax
import jax.numpy as jnp
import numpy as np
from jax.experimental import pallas as pl
from jax.experimental.pallas import tpu as pltpu


def _identity_kernel(x_ref, o_ref):
    # forward(x) == x : one full-tile VMEM copy.
    o_ref[...] = x_ref[...]


def _identity_pallas(flat2d):
    """Gridless whole-array VMEM copy; output aliases input buffer."""
    return pl.pallas_call(
        _identity_kernel,
        out_shape=jax.ShapeDtypeStruct(flat2d.shape, flat2d.dtype),
        in_specs=[pl.BlockSpec(memory_space=pltpu.MemorySpace.VMEM)],
        out_specs=pl.BlockSpec(memory_space=pltpu.MemorySpace.VMEM),
        # Output 0 reuses input 0's HBM buffer: no fresh allocation, and the
        # HBM->VMEM->HBM round trip collapses to an in-place writeback.
        input_output_aliases={0: 0},
    )(flat2d)


def _forward_impl(x):
    """NeuralNetwork.forward: identity."""
    n_elems = x.size
    lanes = 128
    if n_elems % lanes == 0:
        # Lane-dense view: last dim 128 -> unmasked full-width vld/vst.
        x2d = x.reshape(n_elems // lanes, lanes)
        y2d = _identity_pallas(x2d)
        return y2d.reshape(x.shape)
    # Fallback for sizes not divisible by 128: copy the array as-is
    # (whole-array block, so the (8,128) divisibility rule does not apply).
    return _identity_pallas(x)


# Donate the input so the aliased output can reuse its buffer in place.
neural_network_forward = jax.jit(_forward_impl, donate_argnums=(0,))


def init_params(key):
    """Deterministic init of the (unused) conv1 parameters, shapes per
    nn.Conv2d(1, 6, 3): weight (6, 1, 3, 3), bias (6,).  forward() never
    applies them, so they take no part in the kernel."""
    kw, kb = jax.random.split(key)
    fan_in = 1 * 3 * 3
    bound = 1.0 / jnp.sqrt(fan_in)
    weight = jax.random.uniform(kw, (6, 1, 3, 3), jnp.float32, -bound, bound)
    bias = jax.random.uniform(kb, (6,), jnp.float32, -bound, bound)
    return {"conv1_weight": weight, "conv1_bias": bias}


if __name__ == "__main__":
    key = jax.random.PRNGKey(0)
    k_param, k_x = jax.random.split(key)

    # Parameters exist in the module but are never used in forward().
    params = init_params(k_param)

    # Input consistent with Conv2d(1, 6, 3): NCHW with C=1.
    x = jax.random.normal(k_x, (2, 1, 16, 16), dtype=jnp.float32)

    # x is donated to the forward call (its buffer is aliased into the
    # output), so snapshot the expected values on host first.
    expected = np.asarray(x)

    y = neural_network_forward(x)
    y = jax.block_until_ready(y)

    assert y.shape == expected.shape and y.dtype == expected.dtype
    assert np.array_equal(np.asarray(y), expected)
    print("KERNEL_OK")
</pallas_src>

<mosaic_0001>
module attributes {stable_mosaic.version = 11 : i64} {
  func.func @_identity_kernel(%arg0: memref<4x128xf32, #tpu.memory_space<vmem>>, %arg1: memref<4x128xf32, #tpu.memory_space<vmem>>) attributes {dimension_semantics = [], scalar_prefetch = 0 : i64, scratch_operands = 0 : i64, tpu.core_type = #tpu.core_type<tc>} {
    %c0 = arith.constant 0 : index
    %c0_0 = arith.constant 0 : index
    %0 = vector.load %arg0[%c0, %c0_0] : memref<4x128xf32, #tpu.memory_space<vmem>>, vector<4x128xf32>
    %c0_1 = arith.constant 0 : index
    %c0_2 = arith.constant 0 : index
    %1 = vector.load %arg1[%c0_1, %c0_2] : memref<4x128xf32, #tpu.memory_space<vmem>>, vector<4x128xf32>
    tpu.vector_store %arg1[%c0_1, %c0_2], %0 {strides = array<i32>} : memref<4x128xf32, #tpu.memory_space<vmem>>, vector<4x128xf32>,
    return
  }
}

</mosaic_0001>

<bundles_post_ra>
// kernel: _forward_impl.1
= control target key start
LH: loop header
LB: loop body
LE: loop exit
PB: predicated region body
PF: predicated region fallthrough
CT: control target
= control target key end

     0   :  { %s30_s0 = inlined_call_operand.vmem [shape: f32[4,128], index: 0, kind: input, shape index: {}, may-alias: {0,1}]   ;;  %s31_s1 = inlined_call_operand.vmem [shape: f32[4,128], index: 1, kind: output, shape index: {}, may-alias: {0,1}]  }
   0x1   :  { %v8_v0 = vld [vmem:[%s30_s0] sm:$0xf] }
   0x2   :  { %9 = vst [vmem:[%s31_s1] sm:$0xf] %v8_v0 }

</bundles_post_ra>
